<compile_context>
chip_gen: v7x
topology: tpu7x:2x2x1
jax: 0.10.0
libtpu: 0.0.40
codegen_flags: <defaults>
</compile_context>

<pallas_src>
import math

import jax
import jax.numpy as jnp
from jax.experimental import pallas as pl
from jax.experimental.pallas import tpu as pltpu


# ---------------------------------------------------------------------------
# Fused Pallas kernel: attention MLP + kernel aggregation + im2col matmul
# ---------------------------------------------------------------------------
def _dyn_conv_kernel(pooled_ref, w1_ref, b1_ref, w2_ref, b2_ref,
                     w3_ref, b3_ref, p_ref, o_ref, agg_w_ref, agg_b_ref):
    b = pl.program_id(0)            # batch element
    t = pl.program_id(1)            # HWo tile

    @pl.when(t == 0)
    def _prepare():                 # runs once per batch element
        # ---- select pooled row b with a tiny one-hot matmul (no gather) ----
        nb = pooled_ref.shape[0]
        sel = (jax.lax.broadcasted_iota(jnp.int32, (1, nb), 1) == b)
        sel = sel.astype(jnp.float32)
        pooled_b = jnp.dot(sel, pooled_ref[...],
                           preferred_element_type=jnp.float32)          # (1, C)

        # ---- attention MLP; 1/temperature already folded into w2/b2 ----
        h = jnp.dot(pooled_b, w1_ref[...],
                    preferred_element_type=jnp.float32) + b1_ref[...]
        h = jnp.maximum(h, 0.0)                                          # ReLU
        scores = jnp.dot(h, w2_ref[...],
                         preferred_element_type=jnp.float32) + b2_ref[...]
        m = jnp.max(scores, axis=-1, keepdims=True)
        e = jnp.exp(scores - m)
        alpha = e / jnp.sum(e, axis=-1, keepdims=True)                   # (1, K)

        # ---- aggregate the K candidate kernels for this batch element ----
        c_out = agg_w_ref.shape[0]
        nof_kernels = w3_ref.shape[0]
        alpha_bc = jnp.broadcast_to(alpha, (c_out, nof_kernels))         # sublane bcast
        agg_w = jnp.zeros(agg_w_ref.shape, jnp.float32)
        agg_b = jnp.zeros(agg_b_ref.shape, jnp.float32)
        for k in range(nof_kernels):                                     # static, tiny
            ak = alpha_bc[:, k:k + 1]                                    # (C_out, 1)
            agg_w = agg_w + ak * w3_ref[k]                               # (C_out, P)
            agg_b = agg_b + ak * b3_ref[k]                               # (C_out, 1)
        agg_w_ref[...] = agg_w.astype(agg_w_ref.dtype)
        agg_b_ref[...] = agg_b

    # ---- hot path: lane-dense MXU matmul, runs for every (b, t) step ----
    out = jnp.dot(agg_w_ref[...], p_ref[0],
                  preferred_element_type=jnp.float32)                    # (C_out, THW)
    o_ref[0] = (out + agg_b_ref[...]).astype(o_ref.dtype)


# ---------------------------------------------------------------------------
# Plain-JAX glue
# ---------------------------------------------------------------------------
def _im2col(x, kh, kw, stride, padding, dilation):
    """NCHW -> (B, C*kh*kw, H_out*W_out) patches; P index order = (c, i, j).

    Emitted directly in (B, P, HWo) layout so HWo lands on the TPU lane axis
    and no transpose has to materialize in HBM.
    """
    # TODO(synk): build the kh*kw shifted views inside the kernel (row DMA +
    # pltpu.roll) to avoid materializing the kh*kw-inflated patches in HBM.
    B, C, H, W = x.shape
    xp = jnp.pad(x, ((0, 0), (0, 0), (padding, padding), (padding, padding)))
    H_out = (H + 2 * padding - dilation * (kh - 1) - 1) // stride + 1
    W_out = (W + 2 * padding - dilation * (kw - 1) - 1) // stride + 1
    cols = []
    for i in range(kh):
        for j in range(kw):
            patch = xp[:, :,
                       i * dilation: i * dilation + stride * (H_out - 1) + 1: stride,
                       j * dilation: j * dilation + stride * (W_out - 1) + 1: stride]
            cols.append(patch)                               # (B, C, Ho, Wo)
    cols = jnp.stack(cols, axis=2)                           # (B, C, kh*kw, Ho, Wo)
    patches = cols.reshape(B, C * kh * kw, H_out * W_out)    # (B, P, HWo)
    return patches, H_out, W_out


def _round_up(v, m):
    return (v + m - 1) // m * m


def _choose_tile_hwo(hwo, p, c_out, patch_itemsize, budget_bytes=8 * 1024 * 1024):
    """Largest multiple-of-128 HWo tile whose double-buffered patch + output
    blocks stay within a conservative VMEM budget (safe on v5e/v6e/v7x)."""
    tile = min(_round_up(hwo, 128), 4096)
    per_col = 2 * (p * patch_itemsize + c_out * 4)   # double-buffered in + out
    while tile > 128 and tile * per_col > budget_bytes:
        tile -= 128
    return tile


def init_params(key, nof_kernels, reduce, in_channels, out_channels, kernel_size):
    hidden = max(1, in_channels // reduce)
    kh = kw = kernel_size
    ks = jax.random.split(key, 6)
    fan_in = in_channels * kh * kw
    bw = 1.0 / math.sqrt(fan_in)
    bb = 1.0 / math.sqrt(fan_in)
    b1_bound = 1.0 / math.sqrt(in_channels)
    b2_bound = 1.0 / math.sqrt(hidden)
    return {
        "kernels_weights": jax.random.uniform(
            ks[0], (nof_kernels, out_channels, in_channels, kh, kw), jnp.float32, -bw, bw),
        "kernels_bias": jax.random.uniform(
            ks[1], (nof_kernels, out_channels), jnp.float32, -bb, bb),
        "attn_w1": jax.random.uniform(
            ks[2], (in_channels, hidden), jnp.float32, -b1_bound, b1_bound),
        "attn_b1": jax.random.uniform(ks[3], (1, hidden), jnp.float32, -b1_bound, b1_bound),
        "attn_w2": jax.random.uniform(
            ks[4], (hidden, nof_kernels), jnp.float32, -b2_bound, b2_bound),
        "attn_b2": jax.random.uniform(
            ks[5], (1, nof_kernels), jnp.float32, -b2_bound, b2_bound),
    }


def dynamic_convolution_forward(x, params, temperature=1.0, stride=1, padding=0,
                                dilation=1, groups=1, tile_hwo=None,
                                compute_dtype=jnp.float32):
    """DynamicConvolution forward. Returns (out_NCHW, alphas)."""
    assert groups == 1  # TODO(synk): grouped dynamic conv (groups > 1) not implemented
    B, C, H, W = x.shape
    K, C_out, C_in, kh, kw = params["kernels_weights"].shape
    hidden = params["attn_w1"].shape[1]

    x = x.astype(jnp.float32)
    # Global average pool feeding the attention MLP (tiny; avoids re-reading the
    # full image inside the kernel).
    pooled = jnp.mean(x, axis=(2, 3))                                    # (B, C)

    # Fold 1/temperature into the second attention layer (no in-kernel divide).
    inv_t = jnp.float32(1.0 / float(temperature))
    w2 = params["attn_w2"].astype(jnp.float32) * inv_t
    b2 = params["attn_b2"].astype(jnp.float32) * inv_t

    # im2col in lane-dense (B, P, HWo) layout.
    patches, H_out, W_out = _im2col(x, kh, kw, stride, padding, dilation)
    P = C_in * kh * kw
    HWo = H_out * W_out

    if tile_hwo is None:
        tile_hwo = _choose_tile_hwo(HWo, P, C_out, jnp.dtype(compute_dtype).itemsize)
    assert tile_hwo % 128 == 0
    HWo_pad = _round_up(HWo, tile_hwo)
    if HWo_pad != HWo:
        patches = jnp.pad(patches, ((0, 0), (0, 0), (0, HWo_pad - HWo)))
    patches = patches.astype(compute_dtype)   # bf16 on v6e/v7x if desired; f32 here
    n_tiles = HWo_pad // tile_hwo

    # (K, C_out, C_in, kh, kw) -> (K, C_out, P); bias -> (K, C_out, 1).
    w3 = params["kernels_weights"].reshape(K, C_out, P).astype(jnp.float32)
    b3 = params["kernels_bias"].reshape(K, C_out, 1).astype(jnp.float32)

    out_flat = pl.pallas_call(
        _dyn_conv_kernel,
        out_shape=jax.ShapeDtypeStruct((B, C_out, HWo_pad), jnp.float32),
        grid=(B, n_tiles),
        in_specs=[
            pl.BlockSpec((B, C), lambda b, t: (0, 0)),               # pooled x
            pl.BlockSpec((C, hidden), lambda b, t: (0, 0)),          # attn w1
            pl.BlockSpec((1, hidden), lambda b, t: (0, 0)),          # attn b1
            pl.BlockSpec((hidden, K), lambda b, t: (0, 0)),          # attn w2 / T
            pl.BlockSpec((1, K), lambda b, t: (0, 0)),               # attn b2 / T
            pl.BlockSpec((K, C_out, P), lambda b, t: (0, 0, 0)),     # candidate kernels
            pl.BlockSpec((K, C_out, 1), lambda b, t: (0, 0, 0)),     # candidate biases
            pl.BlockSpec((1, P, tile_hwo), lambda b, t: (b, 0, t)),  # patches tile
        ],
        out_specs=pl.BlockSpec((1, C_out, tile_hwo), lambda b, t: (b, 0, t)),
        scratch_shapes=[
            pltpu.VMEM((C_out, P), compute_dtype),   # aggregated weight (per batch)
            pltpu.VMEM((C_out, 1), jnp.float32),     # aggregated bias   (per batch)
        ],
        compiler_params=pltpu.CompilerParams(
            # Batch axis may be split across TensorCores (v7x megacore); the HWo
            # axis carries the per-batch scratch so it stays "arbitrary".
            dimension_semantics=("parallel", "arbitrary"),
            vmem_limit_bytes=32 * 1024 * 1024,
        ),
    )(pooled, params["attn_w1"].astype(jnp.float32),
      params["attn_b1"].astype(jnp.float32), w2, b2, w3, b3, patches)

    # Kernel output is already NCHW-flat: just crop padding and reshape.
    out = out_flat[:, :, :HWo].reshape(B, C_out, H_out, W_out)

    # Attention weights for API parity / inspection (tiny plain-JAX recompute;
    # the Pallas kernel computes its own fused copy that drives the conv).
    h = jax.nn.relu(pooled @ params["attn_w1"] + params["attn_b1"][0])
    alphas = jax.nn.softmax(
        (h @ params["attn_w2"] + params["attn_b2"][0]) / temperature, axis=-1)
    return out, alphas


# ---------------------------------------------------------------------------
# Pure-JAX reference (mirrors the PyTorch forward) for verification
# ---------------------------------------------------------------------------
def reference_forward(x, params, temperature=1.0, stride=1, padding=0, dilation=1):
    B = x.shape[0]
    pool = jnp.mean(x, axis=(2, 3))
    h = jax.nn.relu(pool @ params["attn_w1"] + params["attn_b1"][0])
    scores = (h @ params["attn_w2"] + params["attn_b2"][0]) / temperature
    alphas = jax.nn.softmax(scores, axis=-1)
    outs = []
    for b in range(B):
        agg_w = jnp.einsum("k,koihw->oihw", alphas[b], params["kernels_weights"])
        agg_b = alphas[b] @ params["kernels_bias"]
        y = jax.lax.conv_general_dilated(
            x[b:b + 1], agg_w, window_strides=(stride, stride),
            padding=((padding, padding), (padding, padding)),
            rhs_dilation=(dilation, dilation),
            dimension_numbers=("NCHW", "OIHW", "NCHW"))
        outs.append(y[0] + agg_b[:, None, None])
    return jnp.stack(outs), alphas


if __name__ == "__main__":
    # Module config: DynamicConvolution(nof_kernels=4, reduce=2, in_channels=8,
    #                                   out_channels=8, kernel_size=3, padding=1)
    B, C_in, H, W = 2, 8, 16, 16
    C_out, ksize, nof_kernels, reduce = 8, 3, 4, 2
    stride, padding, dilation = 1, 1, 1
    temperature = 2.0

    key = jax.random.PRNGKey(0)
    kx, kp = jax.random.split(key)
    x = jax.random.normal(kx, (B, C_in, H, W), jnp.float32)
    params = init_params(kp, nof_kernels, reduce, C_in, C_out, ksize)

    # tile_hwo=128 -> 2 HWo tiles per batch element, exercising the
    # pl.when(t == 0) aggregation + scratch-reuse path.
    out, alphas = dynamic_convolution_forward(
        x, params, temperature=temperature,
        stride=stride, padding=padding, dilation=dilation, tile_hwo=128)
    out = jax.block_until_ready(out)

    ref_out, ref_alphas = reference_forward(
        x, params, temperature=temperature,
        stride=stride, padding=padding, dilation=dilation)

    assert out.shape == (B, C_out, H, W), out.shape
    assert jnp.allclose(alphas, ref_alphas, rtol=1e-4, atol=1e-5), "attention mismatch"
    assert jnp.allclose(out, ref_out, rtol=1e-4, atol=1e-4), "conv output mismatch"
    print("KERNEL_OK")
</pallas_src>

<mosaic_0001>
module attributes {stable_mosaic.version = 11 : i64} {
  func.func @_dyn_conv_kernel(%arg0: i32, %arg1: i32, %arg2: memref<2x8xf32, #tpu.memory_space<vmem>>, %arg3: memref<8x4xf32, #tpu.memory_space<vmem>>, %arg4: memref<1x4xf32, #tpu.memory_space<vmem>>, %arg5: memref<4x4xf32, #tpu.memory_space<vmem>>, %arg6: memref<1x4xf32, #tpu.memory_space<vmem>>, %arg7: memref<4x8x72xf32, #tpu.memory_space<vmem>>, %arg8: memref<4x8x1xf32, #tpu.memory_space<vmem>>, %arg9: memref<1x72x128xf32, #tpu.memory_space<vmem>>, %arg10: memref<1x8x128xf32, #tpu.memory_space<vmem>>, %arg11: memref<8x72xf32, #tpu.memory_space<vmem>>, %arg12: memref<8x1xf32, #tpu.memory_space<vmem>>) attributes {dimension_semantics = [#tpu.dimension_semantics<parallel>, #tpu.dimension_semantics<arbitrary>], iteration_bounds = array<i64: 2, 2>, scalar_prefetch = 0 : i64, scratch_operands = 2 : i64, tpu.core_type = #tpu.core_type<tc>, window_params = [{pipeline_mode = #tpu.pipeline_mode<synchronous>, transform_indices = @transform_0, window_bounds = array<i64: 2, 8>}, {pipeline_mode = #tpu.pipeline_mode<synchronous>, transform_indices = @transform_1, window_bounds = array<i64: 8, 4>}, {pipeline_mode = #tpu.pipeline_mode<synchronous>, transform_indices = @transform_2, window_bounds = array<i64: 1, 4>}, {pipeline_mode = #tpu.pipeline_mode<synchronous>, transform_indices = @transform_3, window_bounds = array<i64: 4, 4>}, {pipeline_mode = #tpu.pipeline_mode<synchronous>, transform_indices = @transform_4, window_bounds = array<i64: 1, 4>}, {pipeline_mode = #tpu.pipeline_mode<synchronous>, transform_indices = @transform_5, window_bounds = array<i64: 4, 8, 72>}, {pipeline_mode = #tpu.pipeline_mode<synchronous>, transform_indices = @transform_6, window_bounds = array<i64: 4, 8, 1>}, {transform_indices = @transform_7, window_bounds = array<i64: 1, 72, 128>}, {transform_indices = @transform_8, window_bounds = array<i64: 1, 8, 128>}]} {
    %c0_i32 = arith.constant 0 : i32
    %0 = arith.cmpi eq, %arg1, %c0_i32 : i32
    %1 = arith.extui %0 : i1 to i32
    %c0_i32_0 = arith.constant 0 : i32
    %2 = arith.cmpi ne, %1, %c0_i32_0 : i32
    scf.if %2 {
      %13 = tpu.iota {dimensions = array<i32: 1>} : vector<1x2xi32>
      %14 = vector.broadcast %arg0 : i32 to vector<1x2xi32>
      %15 = arith.cmpi eq, %13, %14 : vector<1x2xi32>
      %16 = arith.extui %15 : vector<1x2xi1> to vector<1x2xi32>
      %17 = arith.sitofp %16 : vector<1x2xi32> to vector<1x2xf32>
      %c0_10 = arith.constant 0 : index
      %c0_11 = arith.constant 0 : index
      %18 = vector.load %arg2[%c0_10, %c0_11] : memref<2x8xf32, #tpu.memory_space<vmem>>, vector<2x8xf32>
      %cst_12 = arith.constant dense<0.000000e+00> : vector<1x8xf32>
      %19 = tpu.matmul %17, %18, %cst_12 {dimension_numbers = #tpu.dot_dimension_numbers<[1], [0], [0], [1], [0, 0, 1, 1], [], []>} : vector<1x2xf32>, vector<2x8xf32>, vector<1x8xf32> -> vector<1x8xf32>
      %c0_13 = arith.constant 0 : index
      %c0_14 = arith.constant 0 : index
      %20 = vector.load %arg3[%c0_13, %c0_14] : memref<8x4xf32, #tpu.memory_space<vmem>>, vector<8x4xf32>
      %cst_15 = arith.constant dense<0.000000e+00> : vector<1x4xf32>
      %21 = tpu.matmul %19, %20, %cst_15 {dimension_numbers = #tpu.dot_dimension_numbers<[1], [0], [0], [1], [0, 0, 1, 1], [], []>} : vector<1x8xf32>, vector<8x4xf32>, vector<1x4xf32> -> vector<1x4xf32>
      %c0_16 = arith.constant 0 : index
      %c0_17 = arith.constant 0 : index
      %22 = vector.load %arg4[%c0_16, %c0_17] : memref<1x4xf32, #tpu.memory_space<vmem>>, vector<1x4xf32>
      %23 = arith.addf %21, %22 : vector<1x4xf32>
      %cst_18 = arith.constant 0.000000e+00 : f32
      %24 = vector.broadcast %cst_18 : f32 to vector<1x4xf32>
      %25 = arith.maximumf %23, %24 : vector<1x4xf32>
      %c0_19 = arith.constant 0 : index
      %c0_20 = arith.constant 0 : index
      %26 = vector.load %arg5[%c0_19, %c0_20] : memref<4x4xf32, #tpu.memory_space<vmem>>, vector<4x4xf32>
      %cst_21 = arith.constant dense<0.000000e+00> : vector<1x4xf32>
      %27 = tpu.matmul %25, %26, %cst_21 {dimension_numbers = #tpu.dot_dimension_numbers<[1], [0], [0], [1], [0, 0, 1, 1], [], []>} : vector<1x4xf32>, vector<4x4xf32>, vector<1x4xf32> -> vector<1x4xf32>
      %c0_22 = arith.constant 0 : index
      %c0_23 = arith.constant 0 : index
      %28 = vector.load %arg6[%c0_22, %c0_23] : memref<1x4xf32, #tpu.memory_space<vmem>>, vector<1x4xf32>
      %29 = arith.addf %27, %28 : vector<1x4xf32>
      %cst_24 = arith.constant dense<0xFF800000> : vector<1xf32>
      %30 = vector.multi_reduction <maximumf>, %29, %cst_24 [1] : vector<1x4xf32> to vector<1xf32>
      %31 = vector.shape_cast %30 : vector<1xf32> to vector<1x1xf32>
      %32 = vector.broadcast %31 : vector<1x1xf32> to vector<1x4xf32>
      %33 = arith.subf %29, %32 : vector<1x4xf32>
      %34 = math.exp %33 : vector<1x4xf32>
      %cst_25 = arith.constant dense<0.000000e+00> : vector<1xf32>
      %35 = vector.multi_reduction <add>, %34, %cst_25 [1] : vector<1x4xf32> to vector<1xf32>
      %36 = vector.shape_cast %35 : vector<1xf32> to vector<1x1xf32>
      %37 = vector.broadcast %36 : vector<1x1xf32> to vector<1x4xf32>
      %38 = arith.divf %34, %37 : vector<1x4xf32>
      %39 = vector.shape_cast %38 : vector<1x4xf32> to vector<1x4xf32>
      %40 = vector.broadcast %39 : vector<1x4xf32> to vector<8x4xf32>
      %cst_26 = arith.constant 0.000000e+00 : f32
      %41 = vector.broadcast %cst_26 : f32 to vector<8x72xf32>
      %cst_27 = arith.constant 0.000000e+00 : f32
      %42 = vector.broadcast %cst_27 : f32 to vector<8x1xf32>
      %43 = vector.extract_strided_slice %40 {offsets = [0, 0], sizes = [8, 1], strides = [1, 1]} : vector<8x4xf32> to vector<8x1xf32>
      %c0_28 = arith.constant 0 : index
      %c0_29 = arith.constant 0 : index
      %c0_30 = arith.constant 0 : index
      %44 = vector.load %arg7[%c0_28, %c0_29, %c0_30] : memref<4x8x72xf32, #tpu.memory_space<vmem>>, vector<1x8x72xf32>
      %45 = vector.shape_cast %44 : vector<1x8x72xf32> to vector<8x72xf32>
      %46 = vector.broadcast %43 : vector<8x1xf32> to vector<8x72xf32>
      %47 = arith.mulf %46, %45 : vector<8x72xf32>
      %48 = arith.addf %41, %47 : vector<8x72xf32>
      %c0_31 = arith.constant 0 : index
      %c0_32 = arith.constant 0 : index
      %c0_33 = arith.constant 0 : index
      %49 = vector.load %arg8[%c0_31, %c0_32, %c0_33] : memref<4x8x1xf32, #tpu.memory_space<vmem>>, vector<1x8x1xf32>
      %50 = vector.shape_cast %49 : vector<1x8x1xf32> to vector<8x1xf32>
      %51 = arith.mulf %43, %50 : vector<8x1xf32>
      %52 = arith.addf %42, %51 : vector<8x1xf32>
      %53 = vector.extract_strided_slice %40 {offsets = [0, 1], sizes = [8, 1], strides = [1, 1]} : vector<8x4xf32> to vector<8x1xf32>
      %c1 = arith.constant 1 : index
      %c0_34 = arith.constant 0 : index
      %c0_35 = arith.constant 0 : index
      %54 = vector.load %arg7[%c1, %c0_34, %c0_35] : memref<4x8x72xf32, #tpu.memory_space<vmem>>, vector<1x8x72xf32>
      %55 = vector.shape_cast %54 : vector<1x8x72xf32> to vector<8x72xf32>
      %56 = vector.broadcast %53 : vector<8x1xf32> to vector<8x72xf32>
      %57 = arith.mulf %56, %55 : vector<8x72xf32>
      %58 = arith.addf %48, %57 : vector<8x72xf32>
      %c1_36 = arith.constant 1 : index
      %c0_37 = arith.constant 0 : index
      %c0_38 = arith.constant 0 : index
      %59 = vector.load %arg8[%c1_36, %c0_37, %c0_38] : memref<4x8x1xf32, #tpu.memory_space<vmem>>, vector<1x8x1xf32>
      %60 = vector.shape_cast %59 : vector<1x8x1xf32> to vector<8x1xf32>
      %61 = arith.mulf %53, %60 : vector<8x1xf32>
      %62 = arith.addf %52, %61 : vector<8x1xf32>
      %63 = vector.extract_strided_slice %40 {offsets = [0, 2], sizes = [8, 1], strides = [1, 1]} : vector<8x4xf32> to vector<8x1xf32>
      %c2 = arith.constant 2 : index
      %c0_39 = arith.constant 0 : index
      %c0_40 = arith.constant 0 : index
      %64 = vector.load %arg7[%c2, %c0_39, %c0_40] : memref<4x8x72xf32, #tpu.memory_space<vmem>>, vector<1x8x72xf32>
      %65 = vector.shape_cast %64 : vector<1x8x72xf32> to vector<8x72xf32>
      %66 = vector.broadcast %63 : vector<8x1xf32> to vector<8x72xf32>
      %67 = arith.mulf %66, %65 : vector<8x72xf32>
      %68 = arith.addf %58, %67 : vector<8x72xf32>
      %c2_41 = arith.constant 2 : index
      %c0_42 = arith.constant 0 : index
      %c0_43 = arith.constant 0 : index
      %69 = vector.load %arg8[%c2_41, %c0_42, %c0_43] : memref<4x8x1xf32, #tpu.memory_space<vmem>>, vector<1x8x1xf32>
      %70 = vector.shape_cast %69 : vector<1x8x1xf32> to vector<8x1xf32>
      %71 = arith.mulf %63, %70 : vector<8x1xf32>
      %72 = arith.addf %62, %71 : vector<8x1xf32>
      %73 = vector.extract_strided_slice %40 {offsets = [0, 3], sizes = [8, 1], strides = [1, 1]} : vector<8x4xf32> to vector<8x1xf32>
      %c3 = arith.constant 3 : index
      %c0_44 = arith.constant 0 : index
      %c0_45 = arith.constant 0 : index
      %74 = vector.load %arg7[%c3, %c0_44, %c0_45] : memref<4x8x72xf32, #tpu.memory_space<vmem>>, vector<1x8x72xf32>
      %75 = vector.shape_cast %74 : vector<1x8x72xf32> to vector<8x72xf32>
      %76 = vector.broadcast %73 : vector<8x1xf32> to vector<8x72xf32>
      %77 = arith.mulf %76, %75 : vector<8x72xf32>
      %78 = arith.addf %68, %77 : vector<8x72xf32>
      %c3_46 = arith.constant 3 : index
      %c0_47 = arith.constant 0 : index
      %c0_48 = arith.constant 0 : index
      %79 = vector.load %arg8[%c3_46, %c0_47, %c0_48] : memref<4x8x1xf32, #tpu.memory_space<vmem>>, vector<1x8x1xf32>
      %80 = vector.shape_cast %79 : vector<1x8x1xf32> to vector<8x1xf32>
      %81 = arith.mulf %73, %80 : vector<8x1xf32>
      %82 = arith.addf %72, %81 : vector<8x1xf32>
      %c0_49 = arith.constant 0 : index
      %c0_50 = arith.constant 0 : index
      %83 = vector.load %arg11[%c0_49, %c0_50] : memref<8x72xf32, #tpu.memory_space<vmem>>, vector<8x72xf32>
      tpu.vector_store %arg11[%c0_49, %c0_50], %78 {strides = array<i32>} : memref<8x72xf32, #tpu.memory_space<vmem>>, vector<8x72xf32>,
      %c0_51 = arith.constant 0 : index
      %c0_52 = arith.constant 0 : index
      %84 = vector.load %arg12[%c0_51, %c0_52] : memref<8x1xf32, #tpu.memory_space<vmem>>, vector<8x1xf32>
      tpu.vector_store %arg12[%c0_51, %c0_52], %82 {strides = array<i32>} : memref<8x1xf32, #tpu.memory_space<vmem>>, vector<8x1xf32>,
    } else {
    }
    %c0 = arith.constant 0 : index
    %c0_1 = arith.constant 0 : index
    %3 = vector.load %arg11[%c0, %c0_1] : memref<8x72xf32, #tpu.memory_space<vmem>>, vector<8x72xf32>
    %c0_2 = arith.constant 0 : index
    %c0_3 = arith.constant 0 : index
    %c0_4 = arith.constant 0 : index
    %4 = vector.load %arg9[%c0_2, %c0_3, %c0_4] : memref<1x72x128xf32, #tpu.memory_space<vmem>>, vector<1x72x128xf32>
    %5 = vector.shape_cast %4 : vector<1x72x128xf32> to vector<72x128xf32>
    %cst = arith.constant dense<0.000000e+00> : vector<8x128xf32>
    %6 = tpu.matmul %3, %5, %cst {dimension_numbers = #tpu.dot_dimension_numbers<[1], [0], [0], [1], [0, 0, 1, 1], [], []>} : vector<8x72xf32>, vector<72x128xf32>, vector<8x128xf32> -> vector<8x128xf32>
    %c0_5 = arith.constant 0 : index
    %c0_6 = arith.constant 0 : index
    %7 = vector.load %arg12[%c0_5, %c0_6] : memref<8x1xf32, #tpu.memory_space<vmem>>, vector<8x1xf32>
    %8 = vector.broadcast %7 : vector<8x1xf32> to vector<8x128xf32>
    %9 = arith.addf %6, %8 : vector<8x128xf32>
    %c0_7 = arith.constant 0 : index
    %c0_8 = arith.constant 0 : index
    %c0_9 = arith.constant 0 : index
    %10 = vector.load %arg10[%c0_7, %c0_8, %c0_9] : memref<1x8x128xf32, #tpu.memory_space<vmem>>, vector<1x8x128xf32>
    %11 = vector.shape_cast %10 : vector<1x8x128xf32> to vector<8x128xf32>
    %12 = vector.shape_cast %9 : vector<8x128xf32> to vector<1x8x128xf32>
    tpu.vector_store %arg10[%c0_7, %c0_8, %c0_9], %12 {strides = array<i32>} : memref<1x8x128xf32, #tpu.memory_space<vmem>>, vector<1x8x128xf32>,
    return
  }
  func.func @transform_0(%arg0: i32, %arg1: i32) -> (i32, i32) {
    %c0_i32 = arith.constant 0 : i32
    %c0_i32_0 = arith.constant 0 : i32
    %c0_i32_1 = arith.constant 0 : i32
    return %c0_i32, %c0_i32_0 : i32, i32
  }
  func.func @transform_1(%arg0: i32, %arg1: i32) -> (i32, i32) {
    %c0_i32 = arith.constant 0 : i32
    %c0_i32_0 = arith.constant 0 : i32
    %c0_i32_1 = arith.constant 0 : i32
    return %c0_i32, %c0_i32_0 : i32, i32
  }
  func.func @transform_2(%arg0: i32, %arg1: i32) -> (i32, i32) {
    %c0_i32 = arith.constant 0 : i32
    %c0_i32_0 = arith.constant 0 : i32
    %c0_i32_1 = arith.constant 0 : i32
    return %c0_i32, %c0_i32_0 : i32, i32
  }
  func.func @transform_3(%arg0: i32, %arg1: i32) -> (i32, i32) {
    %c0_i32 = arith.constant 0 : i32
    %c0_i32_0 = arith.constant 0 : i32
    %c0_i32_1 = arith.constant 0 : i32
    return %c0_i32, %c0_i32_0 : i32, i32
  }
  func.func @transform_4(%arg0: i32, %arg1: i32) -> (i32, i32) {
    %c0_i32 = arith.constant 0 : i32
    %c0_i32_0 = arith.constant 0 : i32
    %c0_i32_1 = arith.constant 0 : i32
    return %c0_i32, %c0_i32_0 : i32, i32
  }
  func.func @transform_5(%arg0: i32, %arg1: i32) -> (i32, i32, i32) {
    %c0_i32 = arith.constant 0 : i32
    %c0_i32_0 = arith.constant 0 : i32
    %c0_i32_1 = arith.constant 0 : i32
    %c0_i32_2 = arith.constant 0 : i32
    return %c0_i32, %c0_i32_0, %c0_i32_1 : i32, i32, i32
  }
  func.func @transform_6(%arg0: i32, %arg1: i32) -> (i32, i32, i32) {
    %c0_i32 = arith.constant 0 : i32
    %c0_i32_0 = arith.constant 0 : i32
    %c0_i32_1 = arith.constant 0 : i32
    %c0_i32_2 = arith.constant 0 : i32
    return %c0_i32, %c0_i32_0, %c0_i32_1 : i32, i32, i32
  }
  func.func @transform_7(%arg0: i32, %arg1: i32) -> (i32, i32, i32) {
    %c0_i32 = arith.constant 0 : i32
    %c0_i32_0 = arith.constant 0 : i32
    return %arg0, %c0_i32, %arg1 : i32, i32, i32
  }
  func.func @transform_8(%arg0: i32, %arg1: i32) -> (i32, i32, i32) {
    %c0_i32 = arith.constant 0 : i32
    %c0_i32_0 = arith.constant 0 : i32
    return %arg0, %c0_i32, %arg1 : i32, i32, i32
  }
}

</mosaic_0001>

<bundles_post_ra>
// kernel: tpu_custom_call.1
= control target key start
LH: loop header
LB: loop body
LE: loop exit
PB: predicated region body
PF: predicated region fallthrough
CT: control target
= control target key end

     0   :  { %13 = vsyncpa [#allocation5], 0  ;;  %s1515_s0 = inlined_call_operand.vmem [shape: f32[2,8], index: 0, kind: input, shape index: {}]   ;;  %s1516_s1 = inlined_call_operand.vmem [shape: f32[8,4], index: 1, kind: input, shape index: {}]   ;;  %s1517_s2 = inlined_call_operand.vmem [shape: f32[1,4], index: 2, kind: input, shape index: {}]   ;;  %s1518_s3 = inlined_call_operand.vmem [shape: f32[4,4], index: 3, kind: input, shape index: {}]   ;;  %s1519_s4 = inlined_call_operand.vmem [shape: f32[1,4], index: 4, kind: input, shape index: {}]   ;;  %s1520_s5 = inlined_call_operand.vmem [shape: f32[4,8,72], index: 5, kind: input, shape index: {}]   ;;  %s1521_s6 = inlined_call_operand.vmem [shape: f32[4,8,1], index: 6, kind: input, shape index: {}]   ;;  %s1522_s7 = inlined_call_operand.hbm [shape: f32[2,72,256], index: 7, kind: input, shape index: {}]   ;;  %s1523_s8 = inlined_call_operand.hbm [shape: f32[2,8,256], index: 8, kind: output, shape index: {}]  }
   0x1   :  { %15 = vsyncpa [#allocation5 + $0x1], 0 }
   0x2   :  { %16 = vsyncpa [#allocation6], 0 }
   0x3   :  { %18 = vsyncpa [#allocation6 + $0x1], 0  ;;  %s1263_s27 = smov 0   ;;  %s1265_s28 = smov 0  }
   0x4   :  { %s1267_s29 = smov 0   ;;  %s1269_s30 = smov 0  }
   0x5   :  { %s1271_s9 = smov 0   ;;  %s1273_s10 = smov 0  }
   0x6   :  { %s1275_s11 = smov 0   ;;  %s1277_s12 = smov 0  }
   0x7 LB: > { %1530 = sst [smem:[#allocation10_spill]] %s1171_s27  ;;  %s872_s13 = sadd.s32 4294967295, %s1199_s12   ;;  %s1199_s12 = sphi %s1277_s12, %s24_s12   ;;  %s1195_s11 = sphi %s1275_s11, %s1546_s11   ;;  %s1191_s10 = sphi %s1273_s10, %s1551_s10   ;;  %s1187_s9 = sphi %s1271_s9, %s1544_s9   ;;  %s1183_s30 = sphi %s1269_s30, %s1550_s30   ;;  %s1179_s29 = sphi %s1267_s29, %s1549_s29   ;;  %s1175_s28 = sphi %s1265_s28, %s1548_s28   ;;  %s1171_s27 = sphi %s1263_s27, %s1547_s27  }
   0x8   : > { %1531 = sst [smem:[#allocation11_spill]] %s1195_s11  ;;  %s873_s14 = sadd.s32 4294967294, %s1199_s12  }
   0x9   : > { %s33_s15 = sadd.s32 1, %s1191_s10  ;;  %s36_s16 = sadd.s32 1, %s1195_s11 }
   0xa   : > { %p34_p0 = scmp.ge.s32.totalorder %s33_s15, 2  ;;  %s192_s17 = sadd.s32 1, %s1179_s29 }
   0xb   : > { %p199_p1 = scmp.ne.s32.totalorder %s1179_s29, %s1175_s28  ;;  %p200_p2 = scmp.eq.s32.totalorder %s1199_s12, 0 }
   0xc   : > { %s1553_s15 = smov (%p34_p0, %s33_s15), 0  ;;  %s1555_s16 = smov (!%p34_p0, %s36_s16), %s1195_s11 }
   0xd   : > { %1532 = sst [smem:[#allocation12_spill]] %s1553_s15  ;;  %s188_s18 = ssub.s32 %s1191_s10, %s1553_s15 }
   0xe   : > { %p1316_p3 = por %p200_p2, %p199_p1  ;;  %p38_p4 = scmp.ge.s32.totalorder %s1555_s16, 2 }
   0xf   : > { %p205_p5 = scmp.ne.s32.totalorder %s1175_s28, %s1171_s27  ;;  %p206_p6 = scmp.eq.s32.totalorder %s872_s13, 0 }
  0x10   : > { %p231_p7 = scmp.eq.s32.totalorder %s872_s13, 3  ;;  %s1557_s16 = smov (%p38_p4, %s1555_s16), 0 }
  0x11   : > { %1534 = sst [smem:[#allocation13_spill]] %s1557_s16  ;;  %p1324_p8 = por %p206_p6, %p205_p5 }
  0x12   : > { %p1328_p9 = por %p231_p7, %p199_p1  ;;  %s187_s22 = ssub.s32 %s1195_s11, %s1557_s16 }
  0x13   : > { %p237_p10 = scmp.eq.s32.totalorder %s873_s14, 3  ;;  %s189_s23 = sor.u32 %s188_s18, %s187_s22 }
  0x14   : > { %s1536_s21 = scalar_select %p1328_p9, 1, 0 }
  0x15   : > { %p190_p11 = scmp.eq.s32.totalorder %s189_s23, 0  ;;  %p1334_p12 = por %p237_p10, %p205_p5 }
  0x16   : > { %p985_p13 = scmp.lt.s32.totalorder %s1199_s12, 4  ;;  %s278_s25 = sand.u32 1, %s1179_s29  }
  0x17   : > { %s1537_s24 = scalar_select %p1334_p12, 1, 0 }
  0x18   : > { %s1341_s26 = scalar_select %p190_p11, %s1179_s29, %s192_s17  }
  0x19   : > { %1538 = sst [smem:[#allocation14_spill]] %s1537_s24  ;;  %s962_s13 = smul.u32 72, %s278_s25 }
  0x1a   : > { %s963_s15 = smul.u32 18, %s1195_s11  ;;  %p1346_p0 = pnand %p985_p13, %p1316_p3 }
  0x1b   : > { %s282_s18 = scalar_lea.vmem [#allocation4], %s962_s13  ;;  %s1358_s19 = scalar_lea.sflag [#allocation5], %s278_s25 }
  0x1c   : > { %s287_s14 = sadd.s32 %s1191_s10, %s963_s15  ;;  %s290_s22 = sshll.u32 %s282_s18, 4  ;;  %s1351_s22 = int_to_ptr.vmem [resolvable:$true] %s290_s22 }
  0x1d   : > { %s876_s23 = sshll.u32 %s287_s14, 7  ;;  %p1073_p2 = pneg %p1346_p0 }
  0x1e   : > { %s1356_s17 = scalar_lea.hbm %s1522_s7, %s876_s23  ;;  %s1076_s16 = scalar_lea.hbm %s1522_s7, 4608 }
  0x1f   : > { %s1071_s11 = scalar_lea.hbm %s1356_s17, 1152  ;;  %p1077_p5 = scmp.lt.u32.totalorder %s1356_s17, %s1522_s7 }
  0x20   : > { %p1072_p1 = scmp.ne.s32.totalorder %s1356_s17, %s1071_s11  ;;  %p1078_p6 = scmp.lt.u32.totalorder %s1076_s16, %s1071_s11 }
  0x21   : > { %p1080_p10 = scmp.lt.u32.totalorder %s1071_s11, %s1356_s17 }
  0x22   : > { %p1074_p3 = pnand %p1073_p2, %p1072_p1  ;;  %p1079_p7 = por %p1078_p6, %p1077_p5 }
  0x24   : > { %p1075_p4 = pneg %p1074_p3  ;;  %p1081_p11 = por %p1080_p10, %p1079_p7 }
  0x26   : > { %p1082_p13 = pnand %p1081_p11, %p1075_p4 }
  0x28   : > { %1085 = shalt.err (!%p1082_p13)
}
  0x29   : > { %s1086_s25 = scalar_lea.vmem %s1351_s22, 1152  ;;  %s1201_s18 = smov [#allocation4]  }
  0x2a   : > { %p1087_p1 = scmp.ne.s32.totalorder %s1351_s22, %s1086_s25  ;;  %s1091_s23 = sshll.u32 %s1201_s18, 4  ;;  %s1092_s23 = int_to_ptr.vmem [resolvable:$false] %s1091_s23 }
  0x2b   : > { %s1093_s15 = scalar_lea.vmem %s1092_s23, 2304  ;;  %p1094_p9 = scmp.lt.s32.totalorder %s1351_s22, %s1092_s23 }
  0x2c   : > { %p1089_p3 = pnand %p1087_p1, %p1073_p2  ;;  %p1095_p5 = scmp.lt.s32.totalorder %s1093_s15, %s1086_s25 }
  0x2e   : > { %p1090_p12 = pneg %p1089_p3  ;;  %p1096_p6 = por %p1095_p5, %p1094_p9 }
  0x30   : > { %p1097_p7 = pnand %p1096_p6, %p1090_p12 }
  0x32   : > { %1100 = shalt.err (!%p1097_p7)
}
  0x33   : > { %s1202_s11 = smov 256   ;;  %s1203_s13 = smov 128  }
  0x34   : > { %s1204_s16 = smov 8   ;;  %p877_p2 = scmp.ge.s32.totalorder %s1199_s12, 1 }
  0x35   : > { %980 = dma.hbm_to_vmem [thread:$0]  (!%p1346_p0), %s1356_s17, 1152, %s1351_s22, %s1358_s19, %s1202_s11, %s1203_s13, %s1204_s16  }
  0x36   : > { %p298_p4 = scmp.lt.s32.totalorder %s1199_s12, 5 }
  0x38   : > { %p299_p10 = pnand %p877_p2, %p298_p4 }
  0x39   : > { %s1389_s24 = sand.u32 (!%p299_p10), 1, %s1175_s28  }
  0x3a   : > { %302 = sbr.rel (%p299_p10) target bundleno = 1456 (0x5b0), region = 52  ;;  %s305_s25 = scalar_lea.sflag (!%p299_p10), [#allocation5], %s1389_s24 }
  0x3b   : > { %s964_s14 = smul.u32 (!%p299_p10), 72, %s1389_s24 }
  0x3d   : > { %s1393_s18 = scalar_lea.vmem (!%p299_p10), [#allocation4], %s964_s14 }
  0x41   : > { %1162 = dma.done.wait (%p1324_p8), %s305_s25, 1152  }
  0x42   : > { %1164 = vsyncadd (%p1324_p8), %s305_s25, 4294966144  ;;  %s878_s27 = sshll.u32 %s1389_s24, 3  ;;  %p879_p9 = scmp.ne.s32.totalorder %s1183_s30, 0 }
  0x43   : > { %s1400_s22 = scalar_lea.vmem [#allocation7], %s878_s27  ;;  %v351_v0 = vld [vmem:[%s1515_s0] sm:$0x3] (!%p879_p9)  ;;  %vm356_vm0 = vcmask (!%p879_p9), 1041408   ;;  %v345_v1 = vlaneseq (!%p879_p9)  ;;  %v1205_v2 = vmov (!%p879_p9), 0.0   ;;  %vm1206_vm1 = vmmov (!%p879_p9), 0  }
  0x44   : > { %344 = sbr.rel (%p879_p9) target bundleno = 1208 (0x4b8), region = 60  ;;  %914 = vmatprep.subr.mxu0 (!%p879_p9), %v1205_v2  ;;  %916 = vmatprep.mubr.msk.f32.mxu0 (!%p879_p9), %vm1206_vm1, %v1205_v2  ;;  %v347_v3 = vstv (!%p879_p9), %s1187_s9  ;;  %vm352_vm2 = vcmask (!%p879_p9), 15360   ;;  %v430_v6 = vld [vmem:[%s1516_s1] sm:$0xff] (!%p879_p9)  ;;  %vm432_vm4 = vcmask (!%p879_p9), 64512   ;;  %vm513_vm5 = vcmask (!%p879_p9), 1043456   ;;  %v887_v20 = vld [vmem:[%s1521_s6 + $0x8] sm:$0xff] (!%p879_p9) }
  0x45   : > { %915 = vmatpush3.msk.msra.mxu0 (!%p879_p9), %vm356_vm0, %v351_v0  ;;  %v346_v4 = vand.u32 (!%p879_p9), 127, %v345_v1  ;;  %919 = vmatprep.subr.mxu1 (!%p879_p9), %v1205_v2  ;;  %v507_v9 = vld [vmem:[%s1518_s3] sm:$0xf] (!%p879_p9)  ;;  %vm509_vm6 = vcmask (!%p879_p9), 31744   ;;  %vm587_vm7 = vcmask (!%p879_p9), 24576   ;;  %s1207_s19 = smov (!%p879_p9), 1  }
  0x46   : > { %921 = vmatprep.mubr.msk.f32.mxu1 (!%p879_p9), %vm1206_vm1, %v1205_v2  ;;  %924 = vmatprep.subr.mxu0 (!%p879_p9), %v1205_v2  ;;  %v431_v10 = vld [vmem:[%s1517_s2] sm:$0x1] (!%p879_p9)  ;;  %v889_v21 = vld [vmem:[%s1521_s6 + $0x10] sm:$0xff] (!%p879_p9)  ;;  %s1208_s15 = smov (!%p879_p9), 2   ;;  %v891_v27 = vld [vmem:[%s1521_s6 + $0x18] sm:$0xff] (!%p879_p9)  ;;  %s1209_s16 = smov (!%p879_p9), 3  }
  0x47   : > { %vm348_vm3 = vcmp.eq.s32.totalorder (!%p879_p9), %v346_v4, %v347_v3  ;;  %920 = vmatpush3.msra.mxu1 (!%p879_p9), %v430_v6  ;;  %v508_v15 = vld [vmem:[%s1519_s4] sm:$0x1] (!%p879_p9)  ;;  %625 = vrot.lane.b32.xlu1 (!%p879_p9), %v887_v20, %s1207_s19  ;;  %v600_v30 = vshrl.u32 (!%p879_p9), %v345_v1, 7  ;;  %s1210_s14 = smov (!%p879_p9), 127   ;;  %s1211_s25 = smov (!%p879_p9), 126   ;;  %vm678_vm8 = vcmask (!%p879_p9), 7168  }
  0x48   : > { %v880_v5 = vsel (!%p879_p9), %vm348_vm3, 1.0, %v1205_v2  ;;  %s1212_s27 = smov (!%p879_p9), 125   ;;  %v610_v43 = vld [vmem:[%s1521_s6] sm:$0xff] (!%p879_p9)  ;;  %v886_v51 = vld [vmem:[%s1520_s5 + $0x8] sm:$0xff] (!%p879_p9)  ;;  %v888_v55 = vld [vmem:[%s1520_s5 + $0x10] sm:$0xff] (!%p879_p9)  ;;  %vm676_vm9 = vcmask (!%p879_p9), 588800  }
  0x49   : > { %917 = vmatmul.mubr.msk.f32.vlgmr.msra.gmra.mrb[0].mxu0 (!%p879_p9), %vm352_vm2, %v880_v5  ;;  %v601_v32 = vsub.s32 (!%p879_p9), 0, %v600_v30  ;;  %v603_v53 = vld [vmem:[%s1520_s5] sm:$0xff] (!%p879_p9)  ;;  %v890_v60 = vld [vmem:[%s1520_s5 + $0x18] sm:$0xff] (!%p879_p9) }
  0x4a   : > { %926 = vmatprep.mubr.msk.f32.mxu0 (!%p879_p9), %vm1206_vm1, %v1205_v2  ;;  %925 = vmatpush3.msk.msra.mxu0 (!%p879_p9), %vm513_vm5, %v507_v9 }
  0x4b   : > { %646 = vrot.lane.b32.xlu1 %v889_v21, %s1208_s15 }
  0xb9   : > { %v626_v33 = vpop.permute.xlu1 %625 }
  0xbd   : > { %v647_v36 = vpop.permute.xlu1 %646 }
 0x11c   : > { %v426_v7 = vpop.f32.mrb[0].mxu0 }
 0x11d   : > { %v918_v8 = vpop.f32.mrb[1].mxu0  ;;  %922 = vmatmul.mubr.msk.f32.vlgmr.msra.gmra.mrb[0].mxu1 %vm432_vm4, %v426_v7 }
 0x1f0   : > { %v502_v11 = vpop.f32.mrb[0].mxu1 }
 0x1f1   : > { %v503_v12 = vadd.f32 %v502_v11, %v431_v10  ;;  %v923_v13 = vpop.f32.mrb[1].mxu1 }
 0x1f3   : > { %v506_v14 = vmax.f32 %v503_v12, 0.0 }
 0x1f5   : > { %927 = vmatmul.mubr.msk.f32.vlgmr.msra.gmra.mrb[2].mxu0 %vm509_vm6, %v506_v14 }
 0x2c8   : > { %v583_v16 = vpop.f32.mrb[2].mxu0 }
 0x2c9   : > { %v584_v17 = vadd.f32 %v583_v16, %v508_v15  ;;  %v928_v18 = vpop.f32.mrb[3].mxu0 }
 0x2cb   : > { %v588_v19 = vsel %vm587_vm7, %v584_v17, -inf }
 0x2cc   : > { %589 = vmax.xlane.f32.xlu0 %v588_v19 }
 0x359   : > { %v590_v22 = vpop.xlane.xlu0 %589 }
 0x35a   : > { %v591_v23 = vsub.f32 %v584_v17, %v590_v22 }
 0x35c   : > { %v592_v24 = vmul.f32 1.442695, %v591_v23 }
 0x35e   : > { %1066 = vpow2.f32 %v592_v24 }
 0x368   : > { %v1067_v25 = vpop.eup %1066 }
 0x369   : > { %v594_v26 = vsel %vm587_vm7, %v1067_v25, 0.0 }
 0x36a   : > { %595 = vadd.xlane.f32.xlu0 %v594_v26 }
 0x380   : > { %667 = vrot.lane.b32.xlu0 %v891_v27, %s1209_s16 }
 0x3f7   : > { %v596_v28 = vpop.xlane.xlu0 %595 }
 0x3f8   : > { %1068 = vrcp.f32 %v596_v28 }
 0x3fb   : > { %v668_v38 = vpop.permute.xlu0 %667 }
 0x402   : > { %v1069_v29 = vpop.eup %1068 }
 0x403   : > { %v598_v31 = vmul.f32 %v1069_v29, %v1067_v25 }
 0x405   : > { %615 = vrot.lane.b32.xlu1 %v598_v31, %s1210_s14  ;;  %965 = vpush %v598_v31  ;;  %v602_v34 = vrot.slane %v598_v31, %v601_v32 }
 0x407   : > { %v628_v35 = vmul.f32 %v626_v33, %v602_v34  ;;  %v649_v37 = vmul.f32 %v647_v36, %v602_v34  ;;  %v670_v39 = vmul.f32 %v668_v38, %v602_v34  ;;  %v611_v45 = vmul.f32 %v610_v43, %v602_v34 }
 0x409   : > { %636 = vrot.lane.b32.xlu1 %v598_v31, %s1211_s25 }
 0x40d   : > { %657 = vrot.lane.b32.xlu1 %v598_v31, %s1212_s27 }
 0x411   : > { %630 = vrot.lane.b32.xlu1 %v628_v35, %s1210_s14 }
 0x415   : > { %651 = vrot.lane.b32.xlu1 %v649_v37, %s1211_s25 }
 0x419   : > { %672 = vrot.lane.b32.xlu1 %v670_v39, %s1212_s27 }
 0x436   : > { %s966_s20 = spop %965 }
 0x437   : > { %v606_v54 = vstv %s966_s20 }
 0x438   : > { %v608_v58 = vmul.f32 %v606_v54, %v603_v53 }
 0x477   : > { %v616_v40 = vpop.permute.xlu1 %615 }
 0x478   : > { %967 = vpush %v616_v40 }
 0x47b   : > { %v637_v41 = vpop.permute.xlu1 %636 }
 0x47c   : > { %969 = vpush %v637_v41 }
 0x47f   : > { %v658_v42 = vpop.permute.xlu1 %657 }
 0x480   : > { %971 = vpush %v658_v42 }
 0x483   : > { %v631_v44 = vpop.permute.xlu1 %630 }
 0x484   : > { %v633_v47 = vadd.f32 %v631_v44, %v611_v45 }
 0x487   : > { %v652_v46 = vpop.permute.xlu1 %651 }
 0x488   : > { %v654_v48 = vadd.f32 %v652_v46, %v633_v47 }
 0x48b   : > { %v673_v49 = vpop.permute.xlu1 %672 }
 0x48c   : > { %v675_v50 = vadd.f32 %v673_v49, %v654_v48 }
 0x48e   : > { %679 = vst.msk [vmem:[#allocation3] sm:$0xff] %vm678_vm8, %v675_v50 }
 0x4a9   : > { %s968_s23 = spop %967 }
 0x4aa   : > { %v618_v52 = vstv %s968_s23 }
 0x4ab   : > { %v620_v56 = vmul.f32 %v886_v51, %v618_v52 }
 0x4ad   : > { %s970_s27 = spop %969  ;;  %v621_v61 = vadd.f32 %v620_v56, %v608_v58 }
 0x4ae   : > { %v639_v57 = vstv %s970_s27 }
 0x4af   : > { %v641_v59 = vmul.f32 %v888_v55, %v639_v57 }
 0x4b1   : > { %s972_s23 = spop %971  ;;  %v642_v63 = vadd.f32 %v641_v59, %v621_v61 }
 0x4b2   : > { %v660_v62 = vstv %s972_s23 }
 0x4b3   : > { %v662_v0 = vmul.f32 %v890_v60, %v660_v62 }
 0x4b5   : > { %v663_v1 = vadd.f32 %v662_v0, %v642_v63 }
 0x4b7   : > { %677 = vst.msk [vmem:[#allocation2] sm:$0xff] %vm676_vm9, %v663_v1 }
 0x4b8 PF: > { %v681_v2 = vld [vmem:[%s1393_s18] sm:$0xff]  ;;  %v682_v3 = vld [vmem:[%s1393_s18 + $0x8] sm:$0xff]  ;;  %v683_v4 = vld [vmem:[%s1393_s18 + $0x10] sm:$0xff]  ;;  %v1213_v5 = vmov 0.0|0.0   ;;  %vm1214_vm10 = vmmov 0   ;;  %v1215_v8 = vmov 0.0  }
 0x4b9   : > { %950 = vmatprep.subr.bf16.mxu0 %v1213_v5  ;;  %v951_v6 = vpack.c.bf16 %v682_v3, %v681_v2  ;;  %v684_v7 = vld [vmem:[%s1393_s18 + $0x18] sm:$0xff]  ;;  %947 = vmatprep.mubr.msk.f32.mxu0 %vm1214_vm10, %v1215_v8  ;;  %v1216_v9 = vmov 0   ;;  %v685_v12 = vld [vmem:[%s1393_s18 + $0x20] sm:$0xff]  ;;  %v686_v13 = vld [vmem:[%s1393_s18 + $0x28] sm:$0xff]  ;;  %vm696_vm11 = vcmask 588800   ;;  %s894_s20 = sshll.u32 %s1187_s9, 1 }
 0x4ba   : > { %1070 = vset.pattern.permute.xlu0 %v1216_v9  ;;  %v954_v10 = vpack.c.bf16 %v684_v7, %v683_v4  ;;  %v690_v11 = vld [vmem:[#allocation3] sm:$0xff]  ;;  %v957_v14 = vpack.c.bf16 %v686_v13, %v685_v12  ;;  %v689_v18 = vld [vmem:[%s1393_s18 + $0x40] sm:$0xff]  ;;  %s783_s15 = sadd.s32 %s1183_s30, %s894_s20  ;;  %s787_s13 = sshll.u32 %s1400_s22, 4  ;;  %s1462_s13 = int_to_ptr.vmem [resolvable:$true] %s787_s13 }
 0x4bb   : > { %952 = vmatpush3.bf16.msra.mxu0 %v951_v6  ;;  %693 = vperm.xlu0 %1070, %v690_v11   ;;  %v687_v15 = vld [vmem:[%s1393_s18 + $0x30] sm:$0xff]  ;;  %v688_v16 = vld [vmem:[%s1393_s18 + $0x38] sm:$0xff]  ;;  %s895_s11 = sshll.u32 %s783_s15, 7  ;;  %s772_s18 = scalar_lea.sflag [#allocation6], %s1389_s24 }
 0x4bc   : > { %953 = vmatprep.subr.bf16.mxu0 %v1213_v5  ;;  %v960_v17 = vpack.c.bf16 %v688_v16, %v687_v15  ;;  %s1460_s25 = scalar_lea.hbm %s1523_s8, %s895_s11  ;;  %s1101_s9 = scalar_lea.vmem %s1462_s13, 128 }
 0x4bd   : > { %p1102_p8 = scmp.ne.s32.totalorder %s1462_s13, %s1101_s9  ;;  %p1540_p12 = scmp.ne.s32.totalorder %s1536_s21, 0 }
 0x4be   : > { %v680_v19 = vld [vmem:[#allocation2] sm:$0xff]  ;;  %s1217_s30 = smov [#allocation7]  }
 0x4bf   : > { %955 = vmatpush3.bf16.msra.mxu0 %v954_v10  ;;  %p1103_p0 = pnand %p1102_p8, %p1540_p12  ;;  %s1105_s27 = sshll.u32 %s1217_s30, 4  ;;  %s1106_s27 = int_to_ptr.vmem [resolvable:$false] %s1105_s27 }
 0x4c0   : > { %956 = vmatprep.subr.bf16.mxu0 %v1213_v5  ;;  %s1107_s17 = scalar_lea.vmem %s1106_s27, 256  ;;  %p1108_p13 = scmp.lt.s32.totalorder %s1462_s13, %s1106_s27 }
 0x4c1   : > { %p1104_p11 = pneg %p1103_p0  ;;  %p1109_p1 = scmp.lt.s32.totalorder %s1107_s17, %s1101_s9 }
 0x4c3   : > { %958 = vmatpush3.bf16.msra.mxu0 %v957_v14  ;;  %p1110_p3 = por %p1109_p1, %p1108_p13 }
 0x4c4   : > { %959 = vmatprep.subr.bf16.mxu0 %v1213_v5 }
 0x4c5   : > { %p1111_p5 = pnand %p1110_p3, %p1104_p11 }
 0x4c7   : > { %961 = vmatpush3.bf16.msra.mxu0 %v960_v17 }
 0x4c8   : > { %945 = vmatprep.subr.mxu0 %v1215_v8 }
 0x4cb   : > { %946 = vmatpush3.msra.mxu0 %v689_v18 }
 0x4cc   : > { %948 = vmatmul.mubr.msk.f32.vlgmr.msra.gmra.mrb[0].mxu0 %vm696_vm11, %v680_v19 }
 0x53a   : > { %v694_v20 = vpop.permute.xlu0 %693 }
 0x59f   : > { %v766_v21 = vpop.f32.mrb[0].mxu0 }
 0x5a0   : > { %v767_v22 = vadd.f32 %v766_v21, %v694_v20  ;;  %v949_v23 = vpop.f32.mrb[1].mxu0 }
 0x5a2   : > { %770 = vst [vmem:[%s1400_s22] sm:$0xff] %v767_v22 }
 0x5a3   : > { %1114 = shalt.err (!%p1111_p5)
}
 0x5a4   : > { %s1115_s24 = scalar_lea.hbm %s1460_s25, 128  ;;  %s1119_s23 = scalar_lea.hbm %s1523_s8, 512 }
 0x5a5   : > { %p1116_p6 = scmp.ne.s32.totalorder %s1460_s25, %s1115_s24  ;;  %p1120_p4 = scmp.lt.u32.totalorder %s1460_s25, %s1523_s8 }
 0x5a6   : > { %p1121_p10 = scmp.lt.u32.totalorder %s1119_s23, %s1115_s24  ;;  %p1123_p8 = scmp.lt.u32.totalorder %s1115_s24, %s1460_s25 }
 0x5a7   : > { %p1117_p7 = pnand %p1116_p6, %p1540_p12 }
 0x5a8   : > { %p1122_p9 = por %p1121_p10, %p1120_p4 }
 0x5a9   : > { %p1118_p2 = pneg %p1117_p7 }
 0x5aa   : > { %p1124_p0 = por %p1123_p8, %p1122_p9 }
 0x5ac   : > { %p1125_p11 = pnand %p1124_p0, %p1118_p2 }
 0x5ae   : > { %1128 = shalt.err (!%p1125_p11)
}
 0x5af   : > { %975 = dma.vmem_to_hbm [thread:$0]  (%p1540_p12), %s1462_s13, 128, %s1460_s25, %s772_s18  }
 0x5b0 PF: > { %s1541_s11 = sld [smem:[#allocation10_spill]]  ;;  %s1542_s16 = sld [smem:[#allocation14_spill]] }
 0x5b1   : > { %p986_p13 = scmp.ge.s32.totalorder %s1199_s12, 2 }
 0x5b6   : > { %s799_s14 = sand.u32 1, %s1541_s11   ;;  %p1543_p1 = scmp.ne.s32.totalorder %s1542_s16, 0 }
 0x5b7   : > { %s800_s9 = scalar_lea.sflag [#allocation6], %s799_s14 }
 0x5b8   : > { %p982_p3 = pnand %p986_p13, %p1543_p1 }
 0x5ba   : > { %1166 = dma.done.wait (!%p982_p3), %s800_s9, 128  }
 0x5bb   : > { %1168 = vsyncadd (!%p982_p3), %s800_s9, 4294967168  ;;  %s24_s12 = sadd.s32 1, %s1199_s12   ;;  %s1544_s9 = sld [smem:[#allocation11_spill]] }
 0x5bc   : > { %p21_p5 = scmp.ge.s32.totalorder %s24_s12, 6   ;;  %s1545_s21 = sld [smem:[#allocation12_spill]] }
 0x5bd   : > { %s1546_s11 = sld [smem:[#allocation13_spill]]  ;;  %s1547_s27 = smov %s1175_s28 }
 0x5be   : > { %s1548_s28 = smov %s1179_s29  ;;  %s1549_s29 = smov %s1341_s26 }
 0x5bf   : > { %s1550_s30 = smov %s1191_s10  ;;  %23 = sbr.rel (!%p21_p5) target bundleno = 7 (0x7), region = 107 }
 0x5c2   : > { %s1551_s10 = smov %s1545_s21 }
 0x5c6   :  { %805 = vsyncpa [#allocation5], 1 }
 0x5c7   :  { %807 = vsyncpa [#allocation5 + $0x1], 1 }
 0x5c8   :  { %808 = vsyncpa [#allocation6], 1 }
 0x5c9   :  { %810 = vsyncpa [#allocation6 + $0x1], 1 }

</bundles_post_ra>
